<compile_context>
chip_gen: v6e
topology: v6e:2x2x1
jax: 0.10.0
libtpu: 0.0.40
codegen_flags: <defaults>
</compile_context>

<pallas_src>
import functools

import jax
import jax.numpy as jnp
from jax.experimental import pallas as pl
from jax.experimental.pallas import tpu as pltpu


def _round_up(v, m):
    return ((v + m - 1) // m) * m


_EDGE_TILE = 8  # edges handled per resident decode output block (sublane dim)


# ---------------------------------------------------------------------------
# Kernel 1: MuxGNN encode
#   h = mean_r relu( ((A[r] @ x) * (1/deg_r)) @ Wl[r].T + x @ Wr[r].T + bl[r] )
# grid = (node_tiles, num_relations);  relation axis = resident f32 accumulator
# ---------------------------------------------------------------------------
def _encode_kernel(A_ref, x_ref, w_ref, b_ref, dinv_ref, h_ref, acc_ref, *,
                   node_tile):
    r = pl.program_id(1)

    @pl.when(r == 0)
    def _():
        acc_ref[...] = jnp.zeros_like(acc_ref)

    i0 = pl.multiple_of(pl.program_id(0) * node_tile, node_tile)
    x_tile = x_ref[pl.ds(i0, node_tile), :]               # (nt, cin_p) bf16

    # neighbor-sum aggregation: exact int8 edge counts -> bf16 MXU, f32 acc.
    a_bf16 = A_ref[...].astype(jnp.float32).astype(jnp.bfloat16)
    agg = jnp.dot(a_bf16, x_ref[...], preferred_element_type=jnp.float32)
    agg = agg * dinv_ref[...]                             # exact f32 mean scale

    # fused [agg | x_tile] @ [Wl^T ; Wr^T]  (single K = 2*cin_p matmul) + bias
    lhs = jnp.concatenate([agg.astype(jnp.bfloat16), x_tile], axis=-1)
    h = jnp.dot(lhs, w_ref[...], preferred_element_type=jnp.float32) + b_ref[...]
    acc_ref[...] += jnp.maximum(h, 0.0)

    @pl.when(r == pl.num_programs(1) - 1)
    def _():
        h_ref[...] = (acc_ref[...] * (1.0 / pl.num_programs(1))).astype(h_ref.dtype)


# ---------------------------------------------------------------------------
# Kernel 2: final SAGEConv on edge_indices[0]
#   z = ((A[0] @ h) * (1/deg_0)) @ Wfl.T + h @ Wfr.T + bf
# ---------------------------------------------------------------------------
def _final_conv_kernel(A_ref, h_ref, w_ref, b_ref, dinv_ref, z_ref, *, node_tile):
    i0 = pl.multiple_of(pl.program_id(0) * node_tile, node_tile)
    h_tile = h_ref[pl.ds(i0, node_tile), :]
    a_bf16 = A_ref[...].astype(jnp.float32).astype(jnp.bfloat16)
    agg = jnp.dot(a_bf16, h_ref[...], preferred_element_type=jnp.float32)
    agg = agg * dinv_ref[...]
    lhs = jnp.concatenate([agg.astype(jnp.bfloat16), h_tile], axis=-1)
    z_ref[...] = (jnp.dot(lhs, w_ref[...], preferred_element_type=jnp.float32)
                  + b_ref[...])


# ---------------------------------------------------------------------------
# Kernel 3: decode  out[e] = sum(z[src[e]] * z[dst[e]])
#   src/dst scalar-prefetched; z rows DMA-gathered from HBM via pl.Element(1).
#   Output block (EDGE_TILE, 128) resident across the inner edge axis.
# ---------------------------------------------------------------------------
def _decode_kernel(src_ref, dst_ref, zs_ref, zd_ref, out_ref):
    del src_ref, dst_ref  # only used inside the index_maps
    j = pl.program_id(1)
    s = jnp.sum(zs_ref[...] * zd_ref[...], axis=-1, keepdims=True)   # (1, 1)
    out_ref[pl.ds(j, 1), :] = jnp.broadcast_to(
        s, (1, out_ref.shape[1])).astype(out_ref.dtype)


# ---------------------------------------------------------------------------
# Plain-JAX glue: dense unnormalized adjacency (edge counts) built directly at
# padded shape / int8 storage dtype, plus the f32 inverse in-degree.
# ---------------------------------------------------------------------------
def _dense_adj_counts(edge_index, n_pad):
    src, dst = edge_index[0], edge_index[1]
    counts = jnp.zeros((n_pad, n_pad), jnp.int32).at[dst, src].add(1)
    deg = jnp.sum(counts, axis=1, keepdims=True).astype(jnp.float32)
    dinv = 1.0 / jnp.maximum(deg, 1.0)
    return counts.astype(jnp.int8), dinv


# ---------------------------------------------------------------------------
# Wrapper: padding / casting glue + three pallas_calls
# ---------------------------------------------------------------------------
def link_prediction_forward(x, edge_indices, edge_label_index,
                            Wl, Wr, bl, Wfl, Wfr, bf, *, node_tile=None):
    num_rel, hidden, cin = Wl.shape
    out_ch = Wfl.shape[0]
    n = x.shape[0]
    src = edge_label_index[0].astype(jnp.int32)
    dst = edge_label_index[1].astype(jnp.int32)
    n_edges = src.shape[0]

    LANE = 128
    cin_p = _round_up(cin, LANE)
    hid_p = _round_up(hidden, LANE)
    out_p = _round_up(out_ch, LANE)
    n_p = _round_up(n, LANE)
    e_p = _round_up(n_edges, _EDGE_TILE)

    f32, bf16 = jnp.float32, jnp.bfloat16

    # -------------- per-generation VMEM budget & node-tile choice ------------
    try:
        phys_vmem = int(pltpu.get_tpu_info().vmem_capacity_bytes)
    except Exception:
        phys_vmem = 64 * 1024 * 1024            # conservative (v7x physical)
    vmem_limit = min(phys_vmem * 3 // 4, 100 * 1024 * 1024)

    def _enc_bytes(nt):                          # full resident sum (encode)
        return (2 * nt * n_p * 1                 # A tile (int8, double-buffered)
                + 6 * nt * n_p                   # int8->bf16 cast temporaries
                + 2 * n_p * cin_p * 2            # x (full, bf16)
                + 2 * 2 * cin_p * hid_p * 2      # stacked [Wl^T;Wr^T] (bf16)
                + 2 * 8 * hid_p * 4              # bias
                + 2 * nt * LANE * 4              # 1/deg (lane-padded)
                + nt * hid_p * 4                 # f32 accumulator scratch
                + 2 * nt * hid_p * 2)            # h output (bf16)

    def _fin_bytes(nt):                          # full resident sum (final conv)
        return (2 * nt * n_p * 1
                + 6 * nt * n_p
                + 2 * n_p * hid_p * 2
                + 2 * 2 * hid_p * out_p * 2
                + 2 * 8 * out_p * 4
                + 2 * nt * LANE * 4
                + 2 * nt * out_p * 4)

    if node_tile is None:
        budget = int(vmem_limit * 0.85)
        cands = [c for c in (1024, 512, 256, 128)
                 if n_p % c == 0 and max(_enc_bytes(c), _fin_bytes(c)) <= budget]
        if not cands:
            cands = [128]                        # n_p is always a multiple of 128
        multi = [c for c in cands if n_p // c >= 2]  # keep both v7x TCs busy
        node_tile = max(multi) if multi else max(cands)
    node_tile = min(node_tile, n_p)
    num_tiles = n_p // node_tile

    # --------------------- operand prep (plain-JAX glue) ---------------------
    adjs = [_dense_adj_counts(ei, n_p) for ei in edge_indices]
    A_i8 = jnp.stack([a for a, _ in adjs])                       # (R, Np, Np) int8
    dinv = jnp.stack([d for _, d in adjs])                       # (R, Np, 1)  f32

    def pad2(a, r_, c_):
        return jnp.pad(a, ((0, r_ - a.shape[0]), (0, c_ - a.shape[1])))

    x_p = pad2(x, n_p, cin_p).astype(bf16)                       # (Np, Cp)
    WlT = jnp.pad(jnp.transpose(Wl, (0, 2, 1)),
                  ((0, 0), (0, cin_p - cin), (0, hid_p - hidden)))
    WrT = jnp.pad(jnp.transpose(Wr, (0, 2, 1)),
                  ((0, 0), (0, cin_p - cin), (0, hid_p - hidden)))
    W = jnp.concatenate([WlT, WrT], axis=1).astype(bf16)         # (R, 2Cp, Hp)
    bl_p = jnp.pad(bl, ((0, 0), (0, hid_p - hidden))).reshape(
        num_rel, 1, hid_p).astype(f32)
    Wf = jnp.concatenate([pad2(Wfl.T, hid_p, out_p),
                          pad2(Wfr.T, hid_p, out_p)], axis=0).astype(bf16)
    bf_p = jnp.pad(bf, (0, out_p - out_ch)).reshape(1, out_p).astype(f32)
    src_p = jnp.pad(src, (0, e_p - n_edges))
    dst_p = jnp.pad(dst, (0, e_p - n_edges))

    # ----------------------------- encode ------------------------------------
    enc_cost = pl.CostEstimate(
        flops=2 * num_rel * (n_p * n_p * cin_p + n_p * 2 * cin_p * hid_p),
        transcendentals=0,
        bytes_accessed=int(num_rel * n_p * n_p * 1 + n_p * cin_p * 2
                           + num_rel * 2 * cin_p * hid_p * 2
                           + num_rel * (hid_p + n_p) * 4 + n_p * hid_p * 2))

    h = pl.pallas_call(
        functools.partial(_encode_kernel, node_tile=node_tile),
        out_shape=jax.ShapeDtypeStruct((n_p, hid_p), bf16),
        grid=(num_tiles, num_rel),
        in_specs=[
            pl.BlockSpec((None, node_tile, n_p), lambda i, r: (r, i, 0)),    # A[r]
            pl.BlockSpec((n_p, cin_p), lambda i, r: (0, 0)),                 # x full
            pl.BlockSpec((None, 2 * cin_p, hid_p), lambda i, r: (r, 0, 0)),  # W[r]
            pl.BlockSpec((None, 1, hid_p), lambda i, r: (r, 0, 0)),          # bl[r]
            pl.BlockSpec((None, node_tile, 1), lambda i, r: (r, i, 0)),      # 1/deg
        ],
        out_specs=pl.BlockSpec((node_tile, hid_p), lambda i, r: (i, 0)),
        scratch_shapes=[pltpu.VMEM((node_tile, hid_p), f32)],
        compiler_params=pltpu.CompilerParams(
            dimension_semantics=("parallel", "arbitrary"),
            vmem_limit_bytes=vmem_limit),
        cost_estimate=enc_cost,
    )(A_i8, x_p, W, bl_p, dinv)

    # -------------------------- final conv -----------------------------------
    z = pl.pallas_call(
        functools.partial(_final_conv_kernel, node_tile=node_tile),
        out_shape=jax.ShapeDtypeStruct((n_p, out_p), f32),
        grid=(num_tiles,),
        in_specs=[
            pl.BlockSpec((None, node_tile, n_p), lambda i: (0, i, 0)),   # A[0] (no HBM slice)
            pl.BlockSpec((n_p, hid_p), lambda i: (0, 0)),                # h full
            pl.BlockSpec((2 * hid_p, out_p), lambda i: (0, 0)),          # [Wfl^T;Wfr^T]
            pl.BlockSpec((1, out_p), lambda i: (0, 0)),                  # bf
            pl.BlockSpec((None, node_tile, 1), lambda i: (0, i, 0)),     # 1/deg[0]
        ],
        out_specs=pl.BlockSpec((node_tile, out_p), lambda i: (i, 0)),
        compiler_params=pltpu.CompilerParams(
            dimension_semantics=("parallel",),
            vmem_limit_bytes=vmem_limit),
    )(A_i8, h, Wf, bf_p, dinv)

    # ----------------------------- decode ------------------------------------
    # Pipelined DMA row-gather: z stays in HBM, Pallas DMAs one (1, out_p) row
    # per operand per edge; output is a lane-dense (EDGE_TILE, 128) resident
    # block written row-by-row and flushed per edge tile.
    scores = pl.pallas_call(
        _decode_kernel,
        out_shape=jax.ShapeDtypeStruct((e_p, 128), f32),
        grid_spec=pltpu.PrefetchScalarGridSpec(
            num_scalar_prefetch=2,
            grid=(e_p // _EDGE_TILE, _EDGE_TILE),
            in_specs=[
                pl.BlockSpec((pl.Element(1), out_p),
                             lambda t, j, s_, d_: (s_[t * _EDGE_TILE + j], 0)),
                pl.BlockSpec((pl.Element(1), out_p),
                             lambda t, j, s_, d_: (d_[t * _EDGE_TILE + j], 0)),
            ],
            out_specs=pl.BlockSpec((_EDGE_TILE, 128),
                                   lambda t, j, s_, d_: (t, 0)),
        ),
        compiler_params=pltpu.CompilerParams(
            dimension_semantics=("arbitrary", "arbitrary")),
    )(src_p, dst_p, z, z)

    return scores[:n_edges, 0]


# ---------------------------------------------------------------------------
# Pure-JAX reference (mirrors PyG SAGEConv mean-aggregation semantics)
# ---------------------------------------------------------------------------
def _forward_ref(x, edge_indices, edge_label_index, Wl, Wr, bl, Wfl, Wfr, bf):
    n = x.shape[0]

    def norm_adj(ei):
        a = jnp.zeros((n, n), jnp.float32).at[ei[1], ei[0]].add(1.0)
        deg = jnp.sum(a, axis=1, keepdims=True)
        return a / jnp.maximum(deg, 1.0)

    As = [norm_adj(ei) for ei in edge_indices]
    hs = [jax.nn.relu((As[r] @ x) @ Wl[r].T + x @ Wr[r].T + bl[r])
          for r in range(len(edge_indices))]
    h = jnp.mean(jnp.stack(hs), axis=0)
    z = (As[0] @ h) @ Wfl.T + h @ Wfr.T + bf
    s, d = edge_label_index[0], edge_label_index[1]
    return jnp.sum(z[s] * z[d], axis=-1)


if __name__ == "__main__":
    # Small deterministic problem
    N, C_IN, HID, C_OUT, R = 16, 8, 32, 16, 3
    E_PER_REL, E_LABEL = 24, 10

    key = jax.random.PRNGKey(0)
    keys = jax.random.split(key, 12)

    x = jax.random.normal(keys[0], (N, C_IN), dtype=jnp.float32)

    edge_indices = [
        jax.random.randint(keys[1 + r], (2, E_PER_REL), 0, N, dtype=jnp.int32)
        for r in range(R)
    ]
    edge_label_index = jax.random.randint(keys[5], (2, E_LABEL), 0, N,
                                          dtype=jnp.int32)

    # synthetic parameters (PyG SAGEConv: lin_l has bias, lin_r has no bias)
    Wl = 0.1 * jax.random.normal(keys[6], (R, HID, C_IN), dtype=jnp.float32)
    Wr = 0.1 * jax.random.normal(keys[7], (R, HID, C_IN), dtype=jnp.float32)
    bl = 0.1 * jax.random.normal(keys[8], (R, HID), dtype=jnp.float32)
    Wfl = 0.1 * jax.random.normal(keys[9], (C_OUT, HID), dtype=jnp.float32)
    Wfr = 0.1 * jax.random.normal(keys[10], (C_OUT, HID), dtype=jnp.float32)
    bf = 0.1 * jax.random.normal(keys[11], (C_OUT,), dtype=jnp.float32)

    out = link_prediction_forward(x, edge_indices, edge_label_index,
                                  Wl, Wr, bl, Wfl, Wfr, bf)
    out = jax.block_until_ready(out)

    ref = _forward_ref(x, edge_indices, edge_label_index,
                       Wl, Wr, bl, Wfl, Wfr, bf)
    assert out.shape == (E_LABEL,)
    assert jnp.allclose(out, ref, rtol=5e-2, atol=7.5e-2), (out, ref)

    print("KERNEL_OK")
</pallas_src>

<mosaic_0001>
module attributes {stable_mosaic.version = 11 : i64} {
  func.func @_encode_kernel(%arg0: i32, %arg1: i32, %arg2: memref<1x128x128xi8, #tpu.memory_space<vmem>>, %arg3: memref<128x128xbf16, #tpu.memory_space<vmem>>, %arg4: memref<1x256x128xbf16, #tpu.memory_space<vmem>>, %arg5: memref<1x1x128xf32, #tpu.memory_space<vmem>>, %arg6: memref<1x128x1xf32, #tpu.memory_space<vmem>>, %arg7: memref<128x128xbf16, #tpu.memory_space<vmem>>, %arg8: memref<128x128xf32, #tpu.memory_space<vmem>>) attributes {dimension_semantics = [#tpu.dimension_semantics<parallel>, #tpu.dimension_semantics<arbitrary>], iteration_bounds = array<i64: 1, 3>, scalar_prefetch = 0 : i64, scratch_operands = 1 : i64, tpu.core_type = #tpu.core_type<tc>, window_params = [{transform_indices = @transform_0, window_bounds = array<i64: 1, 128, 128>}, {pipeline_mode = #tpu.pipeline_mode<synchronous>, transform_indices = @transform_1, window_bounds = array<i64: 128, 128>}, {transform_indices = @transform_2, window_bounds = array<i64: 1, 256, 128>}, {transform_indices = @transform_3, window_bounds = array<i64: 1, 1, 128>}, {transform_indices = @transform_4, window_bounds = array<i64: 1, 128, 1>}, {transform_indices = @transform_5, window_bounds = array<i64: 128, 128>}]} {
    %c0_i32 = arith.constant 0 : i32
    %0 = arith.cmpi eq, %arg1, %c0_i32 : i32
    %1 = arith.extui %0 : i1 to i32
    %c0_i32_0 = arith.constant 0 : i32
    %2 = arith.cmpi ne, %1, %c0_i32_0 : i32
    scf.if %2 {
      %cst_22 = arith.constant 0.000000e+00 : f32
      %34 = vector.broadcast %cst_22 : f32 to vector<128x128xf32>
      %c0_23 = arith.constant 0 : index
      %c0_24 = arith.constant 0 : index
      %35 = vector.load %arg8[%c0_23, %c0_24] : memref<128x128xf32, #tpu.memory_space<vmem>>, vector<128x128xf32>
      tpu.vector_store %arg8[%c0_23, %c0_24], %34 {strides = array<i32>} : memref<128x128xf32, #tpu.memory_space<vmem>>, vector<128x128xf32>,
    } else {
    }
    %c128_i32 = arith.constant 128 : i32
    %3 = arith.muli %arg0, %c128_i32 : i32
    %4 = tpu.assume_multiple %3, 128 : i32
    %5 = arith.index_cast %4 : i32 to index
    %c0 = arith.constant 0 : index
    %6 = vector.load %arg3[%5, %c0] : memref<128x128xbf16, #tpu.memory_space<vmem>>, vector<128x128xbf16>
    %c0_1 = arith.constant 0 : index
    %c0_2 = arith.constant 0 : index
    %c0_3 = arith.constant 0 : index
    %7 = vector.load %arg2[%c0_1, %c0_2, %c0_3] : memref<1x128x128xi8, #tpu.memory_space<vmem>>, vector<1x128x128xi8>
    %8 = vector.shape_cast %7 : vector<1x128x128xi8> to vector<128x128xi8>
    %9 = arith.sitofp %8 : vector<128x128xi8> to vector<128x128xf32>
    %10 = arith.truncf %9 : vector<128x128xf32> to vector<128x128xbf16>
    %c0_4 = arith.constant 0 : index
    %c0_5 = arith.constant 0 : index
    %11 = vector.load %arg3[%c0_4, %c0_5] : memref<128x128xbf16, #tpu.memory_space<vmem>>, vector<128x128xbf16>
    %cst = arith.constant dense<0.000000e+00> : vector<128x128xf32>
    %12 = tpu.matmul %10, %11, %cst {dimension_numbers = #tpu.dot_dimension_numbers<[1], [0], [0], [1], [0, 0, 1, 1], [], []>} : vector<128x128xbf16>, vector<128x128xbf16>, vector<128x128xf32> -> vector<128x128xf32>
    %c0_6 = arith.constant 0 : index
    %c0_7 = arith.constant 0 : index
    %c0_8 = arith.constant 0 : index
    %13 = vector.load %arg6[%c0_6, %c0_7, %c0_8] : memref<1x128x1xf32, #tpu.memory_space<vmem>>, vector<1x128x1xf32>
    %14 = vector.shape_cast %13 : vector<1x128x1xf32> to vector<128x1xf32>
    %15 = vector.broadcast %14 : vector<128x1xf32> to vector<128x128xf32>
    %16 = arith.mulf %12, %15 : vector<128x128xf32>
    %17 = arith.truncf %16 : vector<128x128xf32> to vector<128x128xbf16>
    %18 = tpu.concatenate %17, %6 in 1 : vector<128x128xbf16>, vector<128x128xbf16> -> vector<128x256xbf16>
    %c0_9 = arith.constant 0 : index
    %c0_10 = arith.constant 0 : index
    %c0_11 = arith.constant 0 : index
    %19 = vector.load %arg4[%c0_9, %c0_10, %c0_11] : memref<1x256x128xbf16, #tpu.memory_space<vmem>>, vector<1x256x128xbf16>
    %20 = vector.shape_cast %19 : vector<1x256x128xbf16> to vector<256x128xbf16>
    %cst_12 = arith.constant dense<0.000000e+00> : vector<128x128xf32>
    %21 = tpu.matmul %18, %20, %cst_12 {dimension_numbers = #tpu.dot_dimension_numbers<[1], [0], [0], [1], [0, 0, 1, 1], [], []>} : vector<128x256xbf16>, vector<256x128xbf16>, vector<128x128xf32> -> vector<128x128xf32>
    %c0_13 = arith.constant 0 : index
    %c0_14 = arith.constant 0 : index
    %c0_15 = arith.constant 0 : index
    %22 = vector.load %arg5[%c0_13, %c0_14, %c0_15] : memref<1x1x128xf32, #tpu.memory_space<vmem>>, vector<1x1x128xf32>
    %23 = vector.shape_cast %22 : vector<1x1x128xf32> to vector<1x128xf32>
    %24 = vector.broadcast %23 : vector<1x128xf32> to vector<128x128xf32>
    %25 = arith.addf %21, %24 : vector<128x128xf32>
    %c0_16 = arith.constant 0 : index
    %c0_17 = arith.constant 0 : index
    %26 = vector.load %arg8[%c0_16, %c0_17] : memref<128x128xf32, #tpu.memory_space<vmem>>, vector<128x128xf32>
    %cst_18 = arith.constant 0.000000e+00 : f32
    %27 = vector.broadcast %cst_18 : f32 to vector<128x128xf32>
    %28 = arith.maximumf %25, %27 : vector<128x128xf32>
    %29 = arith.addf %26, %28 : vector<128x128xf32>
    %c0_19 = arith.constant 0 : index
    %c0_20 = arith.constant 0 : index
    %30 = vector.load %arg8[%c0_19, %c0_20] : memref<128x128xf32, #tpu.memory_space<vmem>>, vector<128x128xf32>
    tpu.vector_store %arg8[%c0_19, %c0_20], %29 {strides = array<i32>} : memref<128x128xf32, #tpu.memory_space<vmem>>, vector<128x128xf32>,
    %c2_i32 = arith.constant 2 : i32
    %31 = arith.cmpi eq, %arg1, %c2_i32 : i32
    %32 = arith.extui %31 : i1 to i32
    %c0_i32_21 = arith.constant 0 : i32
    %33 = arith.cmpi ne, %32, %c0_i32_21 : i32
    scf.if %33 {
      %c0_22 = arith.constant 0 : index
      %c0_23 = arith.constant 0 : index
      %34 = vector.load %arg8[%c0_22, %c0_23] : memref<128x128xf32, #tpu.memory_space<vmem>>, vector<128x128xf32>
      %cst_24 = arith.constant 0.333333343 : f32
      %35 = vector.broadcast %cst_24 : f32 to vector<128x128xf32>
      %36 = arith.mulf %34, %35 : vector<128x128xf32>
      %37 = arith.truncf %36 : vector<128x128xf32> to vector<128x128xbf16>
      %c0_25 = arith.constant 0 : index
      %c0_26 = arith.constant 0 : index
      %38 = vector.load %arg7[%c0_25, %c0_26] : memref<128x128xbf16, #tpu.memory_space<vmem>>, vector<128x128xbf16>
      tpu.vector_store %arg7[%c0_25, %c0_26], %37 {strides = array<i32>} : memref<128x128xbf16, #tpu.memory_space<vmem>>, vector<128x128xbf16>,
    } else {
    }
    return
  }
  func.func @transform_0(%arg0: i32, %arg1: i32) -> (i32, i32, i32) {
    %c0_i32 = arith.constant 0 : i32
    %c0_i32_0 = arith.constant 0 : i32
    return %arg1, %arg0, %c0_i32 : i32, i32, i32
  }
  func.func @transform_1(%arg0: i32, %arg1: i32) -> (i32, i32) {
    %c0_i32 = arith.constant 0 : i32
    %c0_i32_0 = arith.constant 0 : i32
    %c0_i32_1 = arith.constant 0 : i32
    return %c0_i32, %c0_i32_0 : i32, i32
  }
  func.func @transform_2(%arg0: i32, %arg1: i32) -> (i32, i32, i32) {
    %c0_i32 = arith.constant 0 : i32
    %c0_i32_0 = arith.constant 0 : i32
    %c0_i32_1 = arith.constant 0 : i32
    return %arg1, %c0_i32, %c0_i32_0 : i32, i32, i32
  }
  func.func @transform_3(%arg0: i32, %arg1: i32) -> (i32, i32, i32) {
    %c0_i32 = arith.constant 0 : i32
    %c0_i32_0 = arith.constant 0 : i32
    %c0_i32_1 = arith.constant 0 : i32
    return %arg1, %c0_i32, %c0_i32_0 : i32, i32, i32
  }
  func.func @transform_4(%arg0: i32, %arg1: i32) -> (i32, i32, i32) {
    %c0_i32 = arith.constant 0 : i32
    %c0_i32_0 = arith.constant 0 : i32
    return %arg1, %arg0, %c0_i32 : i32, i32, i32
  }
  func.func @transform_5(%arg0: i32, %arg1: i32) -> (i32, i32) {
    %c0_i32 = arith.constant 0 : i32
    %c0_i32_0 = arith.constant 0 : i32
    return %arg0, %c0_i32 : i32, i32
  }
}

</mosaic_0001>

<bundles_post_ra>
// kernel: tpu_custom_call.1
= control target key start
LH: loop header
LB: loop body
LE: loop exit
PB: predicated region body
PF: predicated region fallthrough
CT: control target
= control target key end

     0   :  { %10 = vsyncpa [#allocation4], 0  ;;  %s2039_s0 = inlined_call_operand.hbm [shape: s8[3,128,128], index: 0, kind: input, shape index: {}]   ;;  %s2040_s1 = inlined_call_operand.hbm [shape: bf16[128,128], index: 1, kind: input, shape index: {}]   ;;  %s2041_s2 = inlined_call_operand.vmem [shape: bf16[3,256,128], index: 2, kind: input, shape index: {}]   ;;  %s2042_s3 = inlined_call_operand.vmem [shape: f32[3,1,128], index: 3, kind: input, shape index: {}]   ;;  %s2043_s4 = inlined_call_operand.vmem [shape: f32[3,128,1], index: 4, kind: input, shape index: {}]   ;;  %s2044_s5 = inlined_call_operand.hbm [shape: bf16[128,128], index: 5, kind: output, shape index: {}]  }
   0x1   :  { %12 = vsyncpa [#allocation4 + $0x1], 0 }
   0x2   :  { %13 = vsyncpa [#allocation7], 0 }
   0x3   :  { %14 = vsyncpa [#allocation5], 0  ;;  %s1818_s18 = smov 0   ;;  %s1820_s19 = smov 0  }
   0x4   :  { %s1822_s20 = smov 0   ;;  %s1824_s21 = smov 0  }
   0x5   :  { %s1826_s22 = smov 0   ;;  %s1828_s23 = smov 0  }
   0x6 LB: > { %s1261_s24 = sadd.s32 4294967295, %s1775_s23   ;;  %p54_p0 = scmp.ne.s32.totalorder %s1759_s19, %s1755_s18  ;;  %s1775_s23 = sphi %s1828_s23, %s20_s23   ;;  %s1771_s22 = sphi %s1826_s22, %s2055_s22   ;;  %s1767_s21 = sphi %s1824_s21, %s2054_s21   ;;  %s1763_s20 = sphi %s1822_s20, %s2053_s20   ;;  %s1759_s19 = sphi %s1820_s19, %s2052_s19   ;;  %s1755_s18 = sphi %s1818_s18, %s2051_s18  }
   0x7   : > { %p1850_p1 = scmp.eq.s32.totalorder %s1261_s24, 0  ;;  %p1262_p2 = scmp.ge.s32.totalorder %s1775_s23, 1 }
   0x8   : > { %p192_p3 = scmp.lt.s32.totalorder %s1775_s23, 4  ;;  %s1777_s28 = smov [#allocation6]  }
   0x9   : > { %p1858_p4 = por %p1850_p1, %p54_p0  ;;  %s204_s29 = sshll.u32 %s1777_s28, 4  ;;  %s205_s29 = int_to_ptr.vmem [resolvable:$true] %s204_s29 }
   0xa   : > { %p1862_p5 = pnand %p1262_p2, %p192_p3  ;;  %s29_s6 = sadd.s32 1, %s1771_s22 }
   0xb   : > { %s1650_s7 = scalar_lea.vmem %s205_s29, 1024  ;;  %p1658_p12 = scmp.lt.s32.totalorder %s205_s29, %s205_s29 }
   0xc   : > { %p1534_p6 = pneg %p1862_p5  ;;  %p1651_p9 = scmp.ne.s32.totalorder %s205_s29, %s1650_s7 }
   0xd   : > { %p1659_p13 = scmp.lt.s32.totalorder %s1650_s7, %s1650_s7 }
   0xe   : > { %p1870_p7 = pnand %p1534_p6, %p1850_p1 }
   0xf   : > { %p1660_p0 = por %p1659_p13, %p1658_p12 }
  0x10   : > { %p1641_p8 = pneg %p1870_p7 }
  0x12   : > { %p1653_p10 = pnand %p1651_p9, %p1641_p8 }
  0x14   : > { %p1654_p11 = pneg %p1653_p10 }
  0x16   : > { %p1661_p2 = pnand %p1660_p0, %p1654_p11 }
  0x18   : > { %1664 = shalt.err (!%p1661_p2)
}
  0x19   : > { %s1778_s8 = smov 64   ;;  %s1779_s9 = smov 4  }
  0x1a   : > { %1537 = dma.hbm_to_vmem [thread:$0]  (!%p1870_p7), %s2040_s1, 1024, %s205_s29, [#allocation7], %s1778_s8, %s1778_s8, %s1779_s9  }
  0x1b   : > { %p30_p3 = scmp.ge.s32.totalorder %s29_s6, 3  ;;  %s41_s12 = sadd.s32 1, %s1763_s20 }
  0x1c   : > { %p48_p6 = scmp.ne.s32.totalorder %s1763_s20, %s1759_s19  ;;  %p49_p8 = scmp.eq.s32.totalorder %s1775_s23, 0 }
  0x1d   : > { %s2057_s6 = smov (%p30_p3, %s29_s6), 0  ;;  %p1543_p10 = scmp.lt.s32.totalorder %s1775_s23, 3 }
  0x1e   : > { %p50_p9 = por %p49_p8, %p48_p6  ;;  %s36_s13 = ssub.s32 %s1771_s22, %s2057_s6 }
  0x1f   : > { %s218_s14 = sand.u32 1, %s1763_s20   ;;  %p39_p11 = scmp.eq.s32.totalorder %s36_s13, 0 }
  0x20   : > { %s1265_s15 = sshll.u32 %s218_s14, 5  ;;  %s1330_s16 = sshll.u32 %s1771_s22, 9 }
  0x21   : > { %s1894_s17 = scalar_select %p39_p11, %s1763_s20, %s41_s12  }
  0x22   : > { %s230_s29 = scalar_lea.hbm %s2039_s0, %s1330_s16  ;;  %s222_s30 = scalar_lea.vmem [#allocation3], %s1265_s15 }
  0x23   : > { %s231_s7 = sshll.u32 %s222_s30, 4  ;;  %p1899_p7 = pnand %p1543_p10, %p50_p9  ;;  %s232_s7 = int_to_ptr.vmem [resolvable:$true] %s231_s7 }
  0x24   : > { %s219_s9 = scalar_lea.sflag [#allocation4], %s218_s14  ;;  %s1678_s10 = scalar_lea.vmem %s232_s7, 512 }
  0x25   : > { %p1667_p12 = pneg %p1899_p7  ;;  %p1679_p13 = scmp.ne.s32.totalorder %s232_s7, %s1678_s10 }
  0x26   : > { %s1780_s11 = smov [#allocation3]  }
  0x27   : > { %p1681_p0 = pnand %p1679_p13, %p1667_p12  ;;  %s1683_s12 = sshll.u32 %s1780_s11, 4  ;;  %s1684_s12 = int_to_ptr.vmem [resolvable:$false] %s1683_s12 }
  0x28   : > { %s1685_s13 = scalar_lea.vmem %s1684_s12, 1024  ;;  %p1686_p3 = scmp.lt.s32.totalorder %s232_s7, %s1684_s12 }
  0x29   : > { %p1682_p2 = pneg %p1681_p0  ;;  %p1687_p6 = scmp.lt.s32.totalorder %s1685_s13, %s1678_s10 }
  0x2b   : > { %p1688_p8 = por %p1687_p6, %p1686_p3 }
  0x2d   : > { %p1689_p9 = pnand %p1688_p8, %p1682_p2 }
  0x2f   : > { %1692 = shalt.err (!%p1689_p9)
}
  0x30   : > { %s1781_s15 = smov 128   ;;  %s1782_s16 = smov 8  }
  0x31   : > { %1541 = dma.hbm_to_vmem [thread:$0]  (!%p1899_p7), %s230_s29, 512, %s232_s7, %s219_s9, %s1781_s15, %s1781_s15, %s1782_s16  }
  0x32   : > { %270 = sbr.rel (%p1862_p5) target bundleno = 597 (0x255), region = 40  ;;  %s272_s14 = sand.u32 (!%p1862_p5), 1, %s1759_s19  }
  0x33   : > { %s1269_s18 = sshll.u32 (!%p1862_p5), %s272_s14, 5  ;;  %s273_s28 = scalar_lea.sflag (!%p1862_p5), [#allocation4], %s272_s14 }
  0x34   : > { %s1910_s30 = scalar_lea.vmem (!%p1862_p5), [#allocation3], %s1269_s18 }
  0x37   : > { %1742 = dma.done.wait (%p1858_p4), %s273_s28, 512  }
  0x38   : > { %1744 = vsyncadd (%p1858_p4), %s273_s28, 4294966784 }
  0x39   : > { %1746 = dma.done.wait (%p1850_p1), [#allocation7], 1024  }
  0x3a   : > { %1748 = vsyncadd (%p1850_p1), [#allocation7], 4294966272  ;;  %p320_p5 = scmp.lt.s32.totalorder %s1767_s21, 2  ;;  %p1275_p1 = scmp.ne.s32.totalorder %s1767_s21, 0 }
  0x3c   : > { %s1922_s27 = scalar_select %p320_p5, %s1767_s21, 2 }
  0x3d   : > { %343 = sbr.rel (%p1275_p1) target bundleno = 75 (0x4b), region = 52 }
  0x3e   : > { %s1331_s29 = sshll.u32 %s1922_s27, 7  ;;  %s327_s9 = scalar_lea.vmem %s2042_s3, %s1922_s27 }
  0x3f   : > { %s1932_s11 = scalar_lea.vmem %s2041_s2, %s1331_s29  ;;  %s1937_s13 = scalar_lea.vmem %s2043_s4, %s1331_s29 }
  0x42   : > { %v1783_v0 = vmov 0.0  }
  0x43   : > { %344 = vst [vmem:[#allocation2 + $0x30] sm:$0xff] %v1783_v0  ;;  %345 = vst [vmem:[#allocation2] sm:$0xff] %v1783_v0 }
  0x44   : > { %346 = vst [vmem:[#allocation2 + $0x58] sm:$0xff] %v1783_v0  ;;  %347 = vst [vmem:[#allocation2 + $0x18] sm:$0xff] %v1783_v0 }
  0x45   : > { %348 = vst [vmem:[#allocation2 + $0x50] sm:$0xff] %v1783_v0  ;;  %349 = vst [vmem:[#allocation2 + $0x68] sm:$0xff] %v1783_v0 }
  0x46   : > { %350 = vst [vmem:[#allocation2 + $0x8] sm:$0xff] %v1783_v0  ;;  %351 = vst [vmem:[#allocation2 + $0x48] sm:$0xff] %v1783_v0 }
  0x47   : > { %352 = vst [vmem:[#allocation2 + $0x40] sm:$0xff] %v1783_v0  ;;  %353 = vst [vmem:[#allocation2 + $0x20] sm:$0xff] %v1783_v0 }
  0x48   : > { %354 = vst [vmem:[#allocation2 + $0x10] sm:$0xff] %v1783_v0  ;;  %355 = vst [vmem:[#allocation2 + $0x38] sm:$0xff] %v1783_v0 }
  0x49   : > { %356 = vst [vmem:[#allocation2 + $0x60] sm:$0xff] %v1783_v0  ;;  %357 = vst [vmem:[#allocation2 + $0x70] sm:$0xff] %v1783_v0 }
  0x4a   : > { %358 = vst [vmem:[#allocation2 + $0x78] sm:$0xff] %v1783_v0  ;;  %359 = vst [vmem:[#allocation2 + $0x28] sm:$0xff] %v1783_v0 }
  0x4b PF: > { %v1607_v1 = vld [vmem:[#allocation6 + $0x38] sm:$0xff]   ;;  %v1608_v2 = vld [vmem:[#allocation6 + $0x30] sm:$0xff]   ;;  %v1784_v3 = vmov 0   ;;  %v1609_v4 = vld [vmem:[#allocation6 + $0x28] sm:$0xff]   ;;  %p1309_p4 = scmp.ne.s32.totalorder %s1767_s21, 2 }
  0x4c   : > { %1605 = vset.pattern.permute.xlu0 %v1784_v3  ;;  %1606 = vset.pattern.permute.xlu1 %v1784_v3  ;;  %v1610_v5 = vld [vmem:[#allocation6 + $0x20] sm:$0xff]   ;;  %v560_v9 = vld [vmem:[%s1937_s13 + $0x30] sm:$0xff]  ;;  %v559_v10 = vld [vmem:[%s1937_s13 + $0x28] sm:$0xff] }
  0x4d   : > { %1476 = vmatprep.subr.bf16.mxu0 %v1607_v1  ;;  %v1941_v6 = vld [vmem:[%s1910_s30] sm:$0xff]  ;;  %602 = vperm.xlu1 %1606, %v560_v9   ;;  %v561_v11 = vld [vmem:[%s1937_s13 + $0x38] sm:$0xff]  ;;  %v563_v14 = vld [vmem:[%s1937_s13 + $0x48] sm:$0xff] }
  0x4e   : > { %1477 = vmatpush3.bf16.msra.mxu0 %v1607_v1  ;;  %v385_v7 = vunpack.c.l.s8.bf16 %v1941_v6  ;;  %v558_v8 = vld [vmem:[%s1937_s13 + $0x20] sm:$0xff]  ;;  %v1611_v12 = vld [vmem:[#allocation6 + $0x18] sm:$0xff]   ;;  %v1612_v16 = vld [vmem:[#allocation6 + $0x10] sm:$0xff]   ;;  %v386_v35 = vunpack.c.h.s8.bf16 %v1941_v6 }
  0x4f   : > { %1478 = vmatprep.subr.bf16.mxu0 %v1608_v2  ;;  %592 = vperm.xlu0 %1605, %v558_v8   ;;  %v562_v13 = vld [vmem:[%s1937_s13 + $0x40] sm:$0xff]  ;;  %v1615_v15 = vld [vmem:[%s1932_s11 + $0x78] sm:$0xff]   ;;  %v564_v17 = vld [vmem:[%s1937_s13 + $0x50] sm:$0xff] }
  0x50   : > { %1492 = vmatprep.mubr.bf16.mxu0 %v385_v7  ;;  %v1616_v18 = vld [vmem:[%s1932_s11 + $0x38] sm:$0xff]   ;;  %1508 = vmatprep.subr.bf16.mxu1 %v1615_v15  ;;  %v1617_v19 = vld [vmem:[%s1932_s11 + $0x70] sm:$0xff]   ;;  %v1613_v21 = vld [vmem:[#allocation6 + $0x8] sm:$0xff]  }
  0x51   : > { %607 = vperm.xlu1 %1606, %v561_v11   ;;  %v565_v20 = vld [vmem:[%s1937_s13 + $0x58] sm:$0xff]  ;;  %1516 = vmatpush3.bf16.msra.mxu1 %v1616_v18  ;;  %v554_v22 = vld [vmem:[%s1937_s13] sm:$0xff]  ;;  %v1618_v23 = vld [vmem:[%s1932_s11 + $0x30] sm:$0xff]  }
  0x52   : > { %1479 = vmatpush3.bf16.msra.mxu0 %v1608_v2  ;;  %1509 = vmatprep.subr.bf16.mxu1 %v1617_v19  ;;  %v1614_v24 = vld [vmem:[#allocation6] sm:$0xff]   ;;  %v1619_v25 = vld [vmem:[%s1932_s11 + $0x68] sm:$0xff]   ;;  %v1623_v33 = vld [vmem:[%s1932_s11 + $0x58] sm:$0xff]  }
  0x53   : > { %1480 = vmatprep.subr.bf16.mxu0 %v1609_v4  ;;  %597 = vperm.xlu0 %1605, %v559_v10   ;;  %v555_v26 = vld [vmem:[%s1937_s13 + $0x8] sm:$0xff]  ;;  %v566_v27 = vld [vmem:[%s1937_s13 + $0x60] sm:$0xff]  ;;  %v556_v34 = vld [vmem:[%s1937_s13 + $0x10] sm:$0xff] }
  0x54   : > { %v567_v28 = vld [vmem:[%s1937_s13 + $0x68] sm:$0xff]  ;;  %v1621_v30 = vld [vmem:[%s1932_s11 + $0x60] sm:$0xff]   ;;  %v557_v36 = vld [vmem:[%s1937_s13 + $0x18] sm:$0xff] }
  0x55   : > { %617 = vperm.xlu1 %1606, %v563_v14   ;;  %1517 = vmatpush3.bf16.msra.mxu1 %v1618_v23  ;;  %v1620_v29 = vld [vmem:[%s1932_s11 + $0x28] sm:$0xff]   ;;  %v1622_v32 = vld [vmem:[%s1932_s11 + $0x20] sm:$0xff]   ;;  %v1624_v38 = vld [vmem:[%s1932_s11 + $0x18] sm:$0xff]  }
  0x56   : > { %1481 = vmatpush3.bf16.msra.mxu0 %v1609_v4  ;;  %1510 = vmatprep.subr.bf16.mxu1 %v1619_v25  ;;  %v382_v31 = vld [vmem:[%s1910_s30 + $0x8] sm:$0xff]  ;;  %v568_v39 = vld [vmem:[%s1937_s13 + $0x70] sm:$0xff]  ;;  %v569_v42 = vld [vmem:[%s1937_s13 + $0x78] sm:$0xff] }
  0x57   : > { %1482 = vmatprep.subr.bf16.mxu0 %v1610_v5  ;;  %612 = vperm.xlu0 %1605, %v562_v13   ;;  %v387_v37 = vunpack.c.l.s8.bf16 %v382_v31  ;;  %v1625_v40 = vld [vmem:[%s1932_s11 + $0x50] sm:$0xff]   ;;  %v388_v43 = vunpack.c.h.s8.bf16 %v382_v31  ;;  %v384_v45 = vld [vmem:[%s1910_s30 + $0x18] sm:$0xff]  ;;  %v1627_v50 = vld [vmem:[%s1932_s11 + $0x48] sm:$0xff]  }
  0x58   : > { %v383_v41 = vld [vmem:[%s1910_s30 + $0x10] sm:$0xff]  ;;  %v391_v47 = vunpack.c.l.s8.bf16 %v384_v45  ;;  %v392_v48 = vunpack.c.h.s8.bf16 %v384_v45  ;;  %v1628_v51 = vld [vmem:[%s1932_s11 + $0x8] sm:$0xff]   ;;  %v1629_v52 = vld [vmem:[%s1932_s11 + $0x40] sm:$0xff]  }
  0x59   : > { %627 = vperm.xlu1 %1606, %v565_v20   ;;  %1518 = vmatpush3.bf16.msra.mxu1 %v1620_v29  ;;  %v389_v44 = vunpack.c.l.s8.bf16 %v383_v41  ;;  %v390_v46 = vunpack.c.h.s8.bf16 %v383_v41  ;;  %v1626_v49 = vld [vmem:[%s1932_s11 + $0x10] sm:$0xff]   ;;  %v1630_v53 = vld [vmem:[%s1932_s11] sm:$0xff]   ;;  %v1632_v11 = vld [vmem:[#allocation6 + $0x8] sm:$0xff]  }
  0x5a   : > { %1483 = vmatpush3.bf16.msra.mxu0 %v1610_v5  ;;  %1511 = vmatprep.subr.bf16.mxu1 %v1621_v30  ;;  %v1631_v54 = vld [vmem:[#allocation6] sm:$0xff]   ;;  %v1633_v55 = vld [vmem:[#allocation6 + $0x10] sm:$0xff]  }
  0x5b   : > { %1484 = vmatprep.subr.bf16.mxu0 %v1611_v12  ;;  %622 = vperm.xlu0 %1605, %v564_v17  }
  0x5c   : > { %905 = vmatprep.mubr.bf16.mxu1 %v1633_v55  ;;  %v1985_v55 = vld [vmem:[%s327_s9] ss:$0 sm:$0xff] }
  0x5d   : > { %577 = vperm.xlu1 %1606, %v555_v26   ;;  %1519 = vmatpush3.bf16.msra.mxu1 %v1622_v32 }
  0x5e   : > { %1485 = vmatpush3.bf16.msra.mxu0 %v1611_v12  ;;  %1512 = vmatprep.subr.bf16.mxu1 %v1623_v33 }
  0x5f   : > { %1486 = vmatprep.subr.bf16.mxu0 %v1612_v16  ;;  %572 = vperm.xlu0 %1605, %v554_v22  }
  0x61   : > { %637 = vperm.xlu1 %1606, %v567_v28   ;;  %1520 = vmatpush3.bf16.msra.mxu1 %v1624_v38 }
  0x62   : > { %1487 = vmatpush3.bf16.msra.mxu0 %v1612_v16  ;;  %1513 = vmatprep.subr.bf16.mxu1 %v1625_v40 }
  0x63   : > { %1488 = vmatprep.subr.bf16.mxu0 %v1613_v21  ;;  %632 = vperm.xlu0 %1605, %v566_v27  }
  0x65   : > { %587 = vperm.xlu1 %1606, %v557_v36   ;;  %1521 = vmatpush3.bf16.msra.mxu1 %v1626_v49  ;;  %v1636_v36 = vld [vmem:[#allocation6 + $0x28] sm:$0xff]  }
  0x66   : > { %1489 = vmatpush3.bf16.msra.mxu0 %v1613_v21  ;;  %1514 = vmatprep.subr.bf16.mxu1 %v1627_v50 }
  0x67   : > { %1490 = vmatprep.subr.bf16.mxu0 %v1614_v24  ;;  %582 = vperm.xlu0 %1605, %v556_v34  }
  0x69   : > { %647 = vperm.xlu1 %1606, %v569_v42   ;;  %1522 = vmatpush3.bf16.msra.mxu1 %v1628_v51  ;;  %v1637_v42 = vld [vmem:[#allocation6 + $0x30] sm:$0xff]  }
  0x6a   : > { %1491 = vmatpush3.bf16.msra.mxu0 %v1614_v24  ;;  %1515 = vmatprep.subr.bf16.mxu1 %v1629_v52 }
  0x6b   : > { %1412 = vmatprep.subr.bf16.mxu0 %v1615_v15  ;;  %642 = vperm.xlu0 %1605, %v568_v39  }
  0x6d   : > { %1493 = vmatmul.mubr.bf16.vlgmr.msra.gmra.mxu0 %v386_v35  ;;  %1523 = vmatpush3.bf16.msra.mxu1 %v1630_v53 }
  0x6e   : > { %1496 = vmatprep.mubr.bf16.mxu0 %v387_v37  ;;  %1413 = vmatpush3.bf16.msra.mxu0 %v1616_v18 }
  0x6f   : > { %1414 = vmatprep.subr.bf16.mxu0 %v1617_v19 }
  0x72   : > { %1415 = vmatpush3.bf16.msra.mxu0 %v1618_v23  ;;  %v1634_v23 = vld [vmem:[#allocation6 + $0x18] sm:$0xff]  }
  0x73   : > { %1416 = vmatprep.subr.bf16.mxu0 %v1619_v25 }
  0x75   : > { %1497 = vmatmul.mubr.bf16.gmra.mxu0 %v388_v43 }
  0x76   : > { %1500 = vmatprep.mubr.bf16.mxu0 %v389_v44  ;;  %1417 = vmatpush3.bf16.msra.mxu0 %v1620_v29 }
  0x77   : > { %1418 = vmatprep.subr.bf16.mxu0 %v1621_v30  ;;  %v1635_v30 = vld [vmem:[#allocation6 + $0x20] sm:$0xff]  }
  0x7a   : > { %1419 = vmatpush3.bf16.msra.mxu0 %v1622_v32 }
  0x7b   : > { %1420 = vmatprep.subr.bf16.mxu0 %v1623_v33 }
  0x7d   : > { %1501 = vmatmul.mubr.bf16.gmra.mxu0 %v390_v46 }
  0x7e   : > { %1504 = vmatprep.mubr.bf16.mxu0 %v391_v47  ;;  %1421 = vmatpush3.bf16.msra.mxu0 %v1624_v38  ;;  %v1638_v47 = vld [vmem:[#allocation6 + $0x38] sm:$0xff]  }
  0x7f   : > { %1422 = vmatprep.subr.bf16.mxu0 %v1625_v40 }
  0x82   : > { %1423 = vmatpush3.bf16.msra.mxu0 %v1626_v49 }
  0x83   : > { %1424 = vmatprep.subr.bf16.mxu0 %v1627_v50 }
  0x85   : > { %1505 = vmatmul.mubr.bf16.gmra.mxu0 %v392_v48 }
  0x86   : > { %1425 = vmatpush3.bf16.msra.mxu0 %v1628_v51  ;;  %889 = vmatprep.mubr.bf16.mxu0 %v1631_v54 }
  0x87   : > { %1426 = vmatprep.subr.bf16.mxu0 %v1629_v52 }
  0x8a   : > { %1427 = vmatpush3.bf16.msra.mxu0 %v1630_v53 }
  0xc8   : > { %v603_v56 = vpop.permute.xlu1 %602 }
  0xca   : > { %v593_v57 = vpop.permute.xlu0 %592 }
  0xcc   : > { %v608_v58 = vpop.permute.xlu1 %607 }
  0xce   : > { %v598_v59 = vpop.permute.xlu0 %597 }
  0xd0   : > { %v618_v60 = vpop.permute.xlu1 %617 }
  0xd2   : > { %v613_v61 = vpop.permute.xlu0 %612 }
  0xd4   : > { %v628_v62 = vpop.permute.xlu1 %627 }
  0xd6   : > { %v623_v63 = vpop.permute.xlu0 %622 }
  0xd8   : > { %v578_v0 = vpop.permute.xlu1 %577 }
  0xda   : > { %v573_v1 = vpop.permute.xlu0 %572 }
  0xdc   : > { %v638_v4 = vpop.permute.xlu1 %637 }
  0xde   : > { %v633_v6 = vpop.permute.xlu0 %632 }
  0xe0   : > { %v588_v13 = vpop.permute.xlu1 %587 }
  0xe2   : > { %v583_v15 = vpop.permute.xlu0 %582 }
  0xe4   : > { %v648_v49 = vpop.permute.xlu1 %647 }
  0xe6   : > { %v643_v51 = vpop.permute.xlu0 %642 }
 0x12d   : > { %v1494_v2 = vpop.f32.mrf.mxu0 }
 0x12e   : > { %v652_v19 = vmul.f32 %v1494_v2, %v583_v15  ;;  %v956_v15 = vld [vmem:[#allocation2 + $0x58] sm:$0xff] }
 0x12f   : > { %v491_v3 = vpop.f32.mrf.mxu0 }
 0x130   : > { %v650_v8 = vmul.f32 %v573_v1, %v491_v3 }
 0x131   : > { %v1495_v5 = vpop.f32.mrf.mxu0 }
 0x132   : > { %v653_v17 = vmul.f32 %v1495_v5, %v588_v13 }
 0x133   : > { %v494_v7 = vpop.f32.mrf.mxu0 }
 0x134   : > { %v651_v9 = vmul.f32 %v578_v0, %v494_v7  ;;  %v667_v24 = vpack.c.bf16 %v653_v17, %v652_v19 }
 0x135   : > { %v1498_v10 = vpop.f32.mrf.mxu0 }
 0x136   : > { %v666_v12 = vpack.c.bf16 %v651_v9, %v650_v8  ;;  %v656_v29 = vmul.f32 %v1498_v10, %v603_v56 }
 0x137   : > { %v507_v14 = vpop.f32.mrf.mxu0 }
 0x138   : > { %890 = vmatmul.mubr.bf16.vlgmr.msra.gmra.mxu0 %v666_v12  ;;  %v654_v20 = vmul.f32 %v593_v57, %v507_v14 }
 0x139   : > { %v1499_v16 = vpop.f32.mrf.mxu0  ;;  %897 = vmatprep.mubr.bf16.mxu0 %v1632_v11 }
 0x13a   : > { %v657_v27 = vmul.f32 %v1499_v16, %v608_v58  ;;  %v958_v16 = vld [vmem:[#allocation2 + $0x50] sm:$0xff] }
 0x13b   : > { %v510_v18 = vpop.f32.mrf.mxu0 }
 0x13c   : > { %v655_v21 = vmul.f32 %v598_v59, %v510_v18  ;;  %v669_v31 = vpack.c.bf16 %v657_v27, %v656_v29  ;;  %v959_v29 = vld [vmem:[#allocation2 + $0x68] sm:$0xff] }
 0x13d   : > { %v1502_v22 = vpop.f32.mrf.mxu0 }
 0x13e   : > { %v668_v25 = vpack.c.bf16 %v655_v21, %v654_v20  ;;  %v660_v41 = vmul.f32 %v1502_v22, %v623_v63 }
 0x13f   : > { %v523_v26 = vpop.f32.mrf.mxu0 }
 0x140   : > { %898 = vmatmul.mubr.bf16.gmra.mxu0 %v667_v24  ;;  %906 = vmatmul.mubr.bf16.vlgmr.msra.gmra.mxu1 %v668_v25  ;;  %v658_v35 = vmul.f32 %v613_v61, %v523_v26 }
 0x141   : > { %913 = vmatprep.mubr.bf16.mxu1 %v1634_v23  ;;  %v1503_v28 = vpop.f32.mrf.mxu0 }
 0x142   : > { %v661_v39 = vmul.f32 %v1503_v28, %v628_v62  ;;  %v957_v28 = vld [vmem:[#allocation2 + $0x18] sm:$0xff] }
 0x143   : > { %v526_v32 = vpop.f32.mrf.mxu0 }
 0x144   : > { %v659_v33 = vmul.f32 %v618_v60, %v526_v32  ;;  %v671_v43 = vpack.c.bf16 %v661_v39, %v660_v41  ;;  %v954_v60 = vld [vmem:[#allocation2 + $0x30] sm:$0xff] }
 0x145   : > { %v1506_v34 = vpop.f32.mrf.mxu0 }
 0x146   : > { %v670_v37 = vpack.c.bf16 %v659_v33, %v658_v35  ;;  %v664_v52 = vmul.f32 %v1506_v34, %v643_v51 }
 0x147   : > { %v539_v38 = vpop.f32.mrf.mxu0 }
 0x148   : > { %914 = vmatmul.mubr.bf16.gmra.mxu1 %v669_v31  ;;  %v662_v46 = vmul.f32 %v633_v6, %v539_v38  ;;  %v960_v38 = vld [vmem:[#allocation2 + $0x8] sm:$0xff] }
 0x149   : > { %921 = vmatprep.mubr.bf16.mxu1 %v1635_v30  ;;  %v1507_v40 = vpop.f32.mrf.mxu0 }
 0x14a   : > { %v665_v50 = vmul.f32 %v1507_v40, %v648_v49 }
 0x14b   : > { %v542_v44 = vpop.f32.mrf.mxu0 }
 0x14c   : > { %v663_v45 = vmul.f32 %v638_v4, %v542_v44  ;;  %v673_v53 = vpack.c.bf16 %v665_v50, %v664_v52  ;;  %v955_v4 = vld [vmem:[#allocation2] sm:$0xff] }
 0x14d   : > { %v962_v52 = vld [vmem:[#allocation2 + $0x40] sm:$0xff] }
 0x14e   : > { %v672_v48 = vpack.c.bf16 %v663_v45, %v662_v46  ;;  %v961_v45 = vld [vmem:[#allocation2 + $0x48] sm:$0xff] }
 0x150   : > { %922 = vmatmul.mubr.bf16.gmra.mxu1 %v670_v37 }
 0x151   : > { %929 = vmatprep.mubr.bf16.mxu1 %v1636_v36 }
 0x158   : > { %930 = vmatmul.mubr.bf16.gmra.mxu1 %v671_v43 }
 0x159   : > { %937 = vmatprep.mubr.bf16.mxu1 %v1637_v42 }
 0x160   : > { %938 = vmatmul.mubr.bf16.gmra.mxu1 %v672_v48 }
 0x161   : > { %945 = vmatprep.mubr.bf16.mxu1 %v1638_v47 }
 0x168   : > { %946 = vmatmul.mubr.bf16.gmra.mxu1 %v673_v53 }
 0x1f8   : > { %v1428_v54 = vpop.f32.mrf.mxu0 }
 0x1fa   : > { %v1429_v56 = vpop.f32.mrf.mxu0 }
 0x1fb   : > { %v1430_v57 = vadd.f32 %v1429_v56, %v1428_v54 }
 0x1fc   : > { %v1431_v58 = vpop.f32.mrf.mxu0 }
 0x1fd   : > { %v892_v59 = vadd.f32 %v1430_v57, %v1985_v55 }
 0x1fe   : > { %v1432_v61 = vpop.f32.mrf.mxu0 }
 0x1ff   : > { %v970_v62 = vmax.f32 %v892_v59, 0.0  ;;  %v1433_v63 = vadd.f32 %v1432_v61, %v1431_v58 }
 0x200   : > { %v1434_v0 = vpop.f32.mrf.mxu0  ;;  %v1440_v1 = vpop.f32.mrf.mxu1 }
 0x201   : > { %v986_v2 = vadd.f32 %v970_v62, %v954_v60  ;;  %v895_v3 = vadd.f32 %v1433_v63, %v1985_v55  ;;  %v963_v60 = vld [vmem:[#allocation2 + $0x20] sm:$0xff] }
 0x202   : > { %v1435_v5 = vpop.f32.mrf.mxu0  ;;  %v1441_v6 = vpop.f32.mrf.mxu1 }
 0x203   : > { %1002 = vst [vmem:[#allocation2 + $0x30] sm:$0xff] %v986_v2  ;;  %v971_v7 = vmax.f32 %v895_v3, 0.0  ;;  %v1436_v8 = vadd.f32 %v1435_v5, %v1434_v0  ;;  %v1442_v9 = vadd.f32 %v1441_v6, %v1440_v1  ;;  %v964_v3 = vld [vmem:[#allocation2 + $0x10] sm:$0xff] }
 0x204   : > { %v1437_v10 = vpop.f32.mrf.mxu0  ;;  %v1443_v11 = vpop.f32.mrf.mxu1 }
 0x205   : > { %v987_v12 = vadd.f32 %v971_v7, %v955_v4  ;;  %v900_v13 = vadd.f32 %v1436_v8, %v1985_v55  ;;  %v908_v14 = vadd.f32 %v1442_v9, %v1985_v55 }
 0x206   : > { %v1438_v17 = vpop.f32.mrf.mxu0  ;;  %v1444_v18 = vpop.f32.mrf.mxu1 }
 0x207   : > { %1003 = vst [vmem:[#allocation2] sm:$0xff] %v987_v12  ;;  %v972_v19 = vmax.f32 %v900_v13, 0.0  ;;  %v974_v20 = vmax.f32 %v908_v14, 0.0  ;;  %v1439_v21 = vadd.f32 %v1438_v17, %v1437_v10  ;;  %v1445_v22 = vadd.f32 %v1444_v18, %v1443_v11  ;;  %v965_v10 = vld [vmem:[#allocation2 + $0x38] sm:$0xff]  ;;  %v966_v17 = vld [vmem:[#allocation2 + $0x60] sm:$0xff] }
 0x208   : > { %v1446_v23 = vpop.f32.mrf.mxu1 }
 0x209   : > { %v988_v24 = vadd.f32 %v972_v19, %v956_v15  ;;  %v990_v25 = vadd.f32 %v974_v20, %v958_v16  ;;  %v903_v26 = vadd.f32 %v1439_v21, %v1985_v55  ;;  %v911_v27 = vadd.f32 %v1445_v22, %v1985_v55 }
 0x20a   : > { %v1447_v30 = vpop.f32.mrf.mxu1 }
 0x20b   : > { %1004 = vst [vmem:[#allocation2 + $0x58] sm:$0xff] %v988_v24  ;;  %1006 = vst [vmem:[#allocation2 + $0x50] sm:$0xff] %v990_v25  ;;  %v973_v31 = vmax.f32 %v903_v26, 0.0  ;;  %v975_v32 = vmax.f32 %v911_v27, 0.0  ;;  %v1448_v33 = vadd.f32 %v1447_v30, %v1446_v23  ;;  %v967_v24 = vld [vmem:[#allocation2 + $0x70] sm:$0xff] }
 0x20c   : > { %v1449_v34 = vpop.f32.mrf.mxu1 }
 0x20d   : > { %v989_v35 = vadd.f32 %v973_v31, %v957_v28  ;;  %v991_v36 = vadd.f32 %v975_v32, %v959_v29  ;;  %v916_v37 = vadd.f32 %v1448_v33, %v1985_v55  ;;  %v968_v31 = vld [vmem:[#allocation2 + $0x78] sm:$0xff] }
 0x20e   : > { %v1450_v39 = vpop.f32.mrf.mxu1 }
 0x20f   : > { %1005 = vst [vmem:[#allocation2 + $0x18] sm:$0xff] %v989_v35  ;;  %1007 = vst [vmem:[#allocation2 + $0x68] sm:$0xff] %v991_v36  ;;  %v976_v40 = vmax.f32 %v916_v37, 0.0  ;;  %v1451_v41 = vadd.f32 %v1450_v39, %v1449_v34  ;;  %v969_v37 = vld [vmem:[#allocation2 + $0x28] sm:$0xff] }
 0x210   : > { %v1452_v42 = vpop.f32.mrf.mxu1 }
 0x211   : > { %v992_v43 = vadd.f32 %v976_v40, %v960_v38  ;;  %v919_v44 = vadd.f32 %v1451_v41, %v1985_v55 }
 0x212   : > { %v1453_v46 = vpop.f32.mrf.mxu1 }
 0x213   : > { %1008 = vst [vmem:[#allocation2 + $0x8] sm:$0xff] %v992_v43  ;;  %v977_v47 = vmax.f32 %v919_v44, 0.0  ;;  %v1454_v48 = vadd.f32 %v1453_v46, %v1452_v42 }
 0x214   : > { %v1455_v49 = vpop.f32.mrf.mxu1 }
 0x215   : > { %v993_v50 = vadd.f32 %v977_v47, %v961_v45  ;;  %v924_v51 = vadd.f32 %v1454_v48, %v1985_v55 }
 0x216   : > { %v1456_v53 = vpop.f32.mrf.mxu1 }
 0x217   : > { %1009 = vst [vmem:[#allocation2 + $0x48] sm:$0xff] %v993_v50  ;;  %v978_v54 = vmax.f32 %v924_v51, 0.0  ;;  %v1457_v56 = vadd.f32 %v1456_v53, %v1455_v49 }
 0x218   : > { %v1458_v57 = vpop.f32.mrf.mxu1 }
 0x219   : > { %v994_v58 = vadd.f32 %v978_v54, %v962_v52  ;;  %v927_v59 = vadd.f32 %v1457_v56, %v1985_v55 }
 0x21a   : > { %v1459_v61 = vpop.f32.mrf.mxu1 }
 0x21b   : > { %1010 = vst [vmem:[#allocation2 + $0x40] sm:$0xff] %v994_v58  ;;  %v979_v62 = vmax.f32 %v927_v59, 0.0  ;;  %v1460_v63 = vadd.f32 %v1459_v61, %v1458_v57 }
 0x21c   : > { %v1461_v0 = vpop.f32.mrf.mxu1 }
 0x21d   : > { %v995_v1 = vadd.f32 %v979_v62, %v963_v60  ;;  %v932_v2 = vadd.f32 %v1460_v63, %v1985_v55 }
 0x21e   : > { %v1462_v4 = vpop.f32.mrf.mxu1 }
 0x21f   : > { %1011 = vst [vmem:[#allocation2 + $0x20] sm:$0xff] %v995_v1  ;;  %v980_v5 = vmax.f32 %v932_v2, 0.0  ;;  %v1463_v6 = vadd.f32 %v1462_v4, %v1461_v0 }
 0x220   : > { %v1464_v7 = vpop.f32.mrf.mxu1 }
 0x221   : > { %v996_v8 = vadd.f32 %v980_v5, %v964_v3  ;;  %v935_v9 = vadd.f32 %v1463_v6, %v1985_v55 }
 0x222   : > { %v1465_v11 = vpop.f32.mrf.mxu1 }
 0x223   : > { %1012 = vst [vmem:[#allocation2 + $0x10] sm:$0xff] %v996_v8  ;;  %v981_v12 = vmax.f32 %v935_v9, 0.0  ;;  %v1466_v13 = vadd.f32 %v1465_v11, %v1464_v7 }
 0x224   : > { %v1467_v14 = vpop.f32.mrf.mxu1 }
 0x225   : > { %v997_v15 = vadd.f32 %v981_v12, %v965_v10  ;;  %v940_v16 = vadd.f32 %v1466_v13, %v1985_v55 }
 0x226   : > { %v1468_v18 = vpop.f32.mrf.mxu1 }
 0x227   : > { %1013 = vst [vmem:[#allocation2 + $0x38] sm:$0xff] %v997_v15  ;;  %v982_v19 = vmax.f32 %v940_v16, 0.0  ;;  %v1469_v20 = vadd.f32 %v1468_v18, %v1467_v14 }
 0x228   : > { %v1470_v21 = vpop.f32.mrf.mxu1 }
 0x229   : > { %v998_v22 = vadd.f32 %v982_v19, %v966_v17  ;;  %v943_v23 = vadd.f32 %v1469_v20, %v1985_v55 }
 0x22a   : > { %v1471_v25 = vpop.f32.mrf.mxu1 }
 0x22b   : > { %1014 = vst [vmem:[#allocation2 + $0x60] sm:$0xff] %v998_v22  ;;  %v983_v26 = vmax.f32 %v943_v23, 0.0  ;;  %v1472_v27 = vadd.f32 %v1471_v25, %v1470_v21 }
 0x22c   : > { %v1473_v28 = vpop.f32.mrf.mxu1 }
 0x22d   : > { %v999_v29 = vadd.f32 %v983_v26, %v967_v24  ;;  %v948_v30 = vadd.f32 %v1472_v27, %v1985_v55 }
 0x22e   : > { %v1474_v32 = vpop.f32.mrf.mxu1 }
 0x22f   : > { %1015 = vst [vmem:[#allocation2 + $0x70] sm:$0xff] %v999_v29  ;;  %v984_v33 = vmax.f32 %v948_v30, 0.0  ;;  %v1475_v34 = vadd.f32 %v1474_v32, %v1473_v28 }
 0x231   : > { %v1000_v35 = vadd.f32 %v984_v33, %v968_v31  ;;  %v951_v36 = vadd.f32 %v1475_v34, %v1985_v55 }
 0x233   : > { %1016 = vst [vmem:[#allocation2 + $0x78] sm:$0xff] %v1000_v35  ;;  %v985_v38 = vmax.f32 %v951_v36, 0.0  ;;  %1021 = sbr.rel (%p1309_p4) target bundleno = 581 (0x245), region = 56 }
 0x235   : > { %v1001_v39 = vadd.f32 %v985_v38, %v969_v37 }
 0x237   : > { %1017 = vst [vmem:[#allocation2 + $0x28] sm:$0xff] %v1001_v39 }
 0x238   : > { %v1022_v40 = vld [vmem:[#allocation2 + $0x30] sm:$0xff]  ;;  %v1023_v41 = vld [vmem:[#allocation2] sm:$0xff]  ;;  %v1024_v42 = vld [vmem:[#allocation2 + $0x58] sm:$0xff] }
 0x239   : > { %v1038_v43 = vmul.f32 0.33333334, %v1022_v40  ;;  %v1039_v44 = vmul.f32 0.33333334, %v1023_v41  ;;  %v1025_v45 = vld [vmem:[#allocation2 + $0x18] sm:$0xff]  ;;  %v1026_v46 = vld [vmem:[#allocation2 + $0x50] sm:$0xff] }
 0x23a   : > { %v1040_v47 = vmul.f32 0.33333334, %v1024_v42  ;;  %v1041_v48 = vmul.f32 0.33333334, %v1025_v45  ;;  %v1027_v49 = vld [vmem:[#allocation2 + $0x68] sm:$0xff]  ;;  %v1030_v54 = vld [vmem:[#allocation2 + $0x40] sm:$0xff] }
 0x23b   : > { %v1028_v50 = vld [vmem:[#allocation2 + $0x8] sm:$0xff]  ;;  %v1352_v55 = vpack.c.bf16 %v1039_v44, %v1038_v43  ;;  %v1042_v51 = vmul.f32 0.33333334, %v1026_v46  ;;  %v1043_v52 = vmul.f32 0.33333334, %v1027_v49  ;;  %v1031_v59 = vld [vmem:[#allocation2 + $0x20] sm:$0xff] }
 0x23c   : > { %v1029_v53 = vld [vmem:[#allocation2 + $0x48] sm:$0xff]  ;;  %v1357_v56 = vpack.c.bf16 %v1041_v48, %v1040_v47  ;;  %v1044_v57 = vmul.f32 0.33333334, %v1028_v50  ;;  %v1032_v60 = vld [vmem:[#allocation2 + $0x10] sm:$0xff]  ;;  %v1046_v62 = vmul.f32 0.33333334, %v1030_v54 }
 0x23d   : > { %v1045_v58 = vmul.f32 0.33333334, %v1029_v53  ;;  %1353 = vst [vmem:[#allocation8] sm:$0xff] %v1352_v55   ;;  %v1362_v61 = vpack.c.bf16 %v1043_v52, %v1042_v51  ;;  %v1047_v63 = vmul.f32 0.33333334, %v1031_v59  ;;  %v1033_v0 = vld [vmem:[#allocation2 + $0x38] sm:$0xff] }
 0x23e   : > { %v1034_v1 = vld [vmem:[#allocation2 + $0x60] sm:$0xff]  ;;  %1389 = vst [vmem:[#allocation8 + $0x8] sm:$0xff] %v1357_v56   ;;  %v1048_v3 = vmul.f32 0.33333334, %v1032_v60  ;;  %v1049_v4 = vmul.f32 0.33333334, %v1033_v0 }
 0x23f   : > { %v1367_v2 = vpack.c.bf16 %v1045_v58, %v1044_v57  ;;  %v1035_v5 = vld [vmem:[#allocation2 + $0x70] sm:$0xff]  ;;  %v1036_v6 = vld [vmem:[#allocation2 + $0x78] sm:$0xff]  ;;  %1390 = vst [vmem:[#allocation8 + $0x10] sm:$0xff] %v1362_v61   ;;  %v1372_v7 = vpack.c.bf16 %v1047_v63, %v1046_v62  ;;  %v1050_v8 = vmul.f32 0.33333334, %v1034_v1  ;;  %v1037_v10 = vld [vmem:[#allocation2 + $0x28] sm:$0xff] }
 0x240   : > { %v1051_v9 = vmul.f32 0.33333334, %v1035_v5  ;;  %v1377_v11 = vpack.c.bf16 %v1049_v4, %v1048_v3  ;;  %v1052_v12 = vmul.f32 0.33333334, %v1036_v6  ;;  %v1053_v13 = vmul.f32 0.33333334, %v1037_v10 }
 0x241   : > { %1391 = vst [vmem:[#allocation8 + $0x18] sm:$0xff] %v1367_v2   ;;  %1392 = vst [vmem:[#allocation8 + $0x20] sm:$0xff] %v1372_v7  }
 0x242   : > { %v1382_v14 = vpack.c.bf16 %v1051_v9, %v1050_v8  ;;  %1393 = vst [vmem:[#allocation8 + $0x28] sm:$0xff] %v1377_v11   ;;  %v1387_v15 = vpack.c.bf16 %v1053_v13, %v1052_v12 }
 0x244   : > { %1394 = vst [vmem:[#allocation8 + $0x30] sm:$0xff] %v1382_v14   ;;  %1395 = vst [vmem:[#allocation8 + $0x38] sm:$0xff] %v1387_v15  }
 0x245 PF: > { %p2006_p10 = scmp.eq.s32.totalorder %s1261_s24, 2  ;;  %s1785_s14 = smov [#allocation8]  }
 0x246   : > { %s1143_s18 = sshll.u32 %s1785_s14, 4  ;;  %s1144_s18 = int_to_ptr.vmem [resolvable:$true] %s1143_s18 }
 0x247   : > { %s1693_s28 = scalar_lea.vmem %s1144_s18, 1024  ;;  %p1700_p13 = scmp.lt.s32.totalorder %s1144_s18, %s1144_s18 }
 0x248   : > { %p1694_p11 = scmp.ne.s32.totalorder %s1144_s18, %s1693_s28  ;;  %p1701_p0 = scmp.lt.s32.totalorder %s1693_s28, %s1693_s28 }
 0x24a   : > { %p1695_p7 = pnand %p1694_p11, %p2006_p10  ;;  %p1702_p2 = por %p1701_p0, %p1700_p13 }
 0x24c   : > { %p1696_p12 = pneg %p1695_p7 }
 0x24e   : > { %p1703_p3 = pnand %p1702_p2, %p1696_p12 }
 0x250   : > { %1706 = shalt.err (!%p1703_p3)
}
 0x251   : > { %s1786_s30 = smov 64   ;;  %s1787_s24 = smov 4  }
 0x252   : > { %1531 = dma.vmem_to_hbm [thread:$0]  (%p2006_p10), %s1144_s18, 1024, %s2044_s5, [#allocation5], %s1786_s30, %s1786_s30, %s1787_s24  }
 0x253   : > { %1750 = dma.done.wait (%p2006_p10), [#allocation5], 1024  }
 0x254   : > { %1752 = vsyncadd (%p2006_p10), [#allocation5], 4294966272 }
 0x255 PF: > { %s20_s23 = sadd.s32 1, %s1775_s23   ;;  %s2051_s18 = smov %s1759_s19 }
 0x256   : > { %p17_p6 = scmp.ge.s32.totalorder %s20_s23, 5   ;;  %s2052_s19 = smov %s1763_s20 }
 0x257   : > { %s2053_s20 = smov %s1894_s17  ;;  %s2054_s21 = smov %s1771_s22 }
 0x258   : > { %s2055_s22 = smov %s2057_s6  ;;  %19 = sbr.rel (!%p17_p6) target bundleno = 6 (0x6), region = 100 }
 0x25d   :  { %1159 = vsyncpa [#allocation4], 1 }
 0x25e   :  { %1161 = vsyncpa [#allocation4 + $0x1], 1 }
 0x25f   :  { %1162 = vsyncpa [#allocation7], 1 }
 0x260   :  { %1163 = vsyncpa [#allocation5], 1 }
 0x261   :  { %1165 = vsyncpa [#allocation5 + $0x1], 1 }

</bundles_post_ra>
